<compile_context>
chip_gen: v6e
topology: v6e:2x2x1
jax: 0.10.0
libtpu: 0.0.40
codegen_flags: <defaults>
</compile_context>

<pallas_src>
import jax
import jax.numpy as jnp
from jax.experimental import pallas as pl
from jax.experimental.pallas import tpu as pltpu


def _vmem_capacity_bytes():
    """Generation-aware VMEM capacity; conservative fallback if query fails."""
    try:
        cap = getattr(pltpu.get_tpu_info(), "vmem_capacity_bytes", None)
        if cap:
            return int(cap)
    except Exception:
        pass
    return 64 * 1024 * 1024  # v7x per-TC VMEM (smallest of the targeted chips)


def channel_attention_3d(x, w1, w2, *, tile_s=None):
    """x: (N, C, D, H, W) float; w1: (mid, C); w2: (C, mid). Returns (N, C, 1, 1, 1)."""
    N, C, D, H, W = x.shape
    mid = w1.shape[0]
    assert w1.shape == (mid, C), "w1 must be (mid, C)"
    assert w2.shape == (C, mid), "w2 must be (C, mid)"
    assert jnp.issubdtype(x.dtype, jnp.floating), "float input required (max mask uses -inf)"
    S = D * H * W
    itemsize = jnp.dtype(x.dtype).itemsize

    # ---- tiling ---------------------------------------------------------------
    # N tile: keep the (tile_n, C) pooled block sublane-legal (multiple of 8 or full N).
    tile_n = 8 if (N > 8 and N % 8 == 0) else N
    n_blk_n = N // tile_n

    # Generation-aware block budget: ~16 MiB blocks on 128 MiB VMEM (v5e/v6e),
    # ~8 MiB on 64 MiB VMEM (v7x); the pipeline double-buffers each block.
    vmem_cap = _vmem_capacity_bytes()
    max_block_bytes = min(16 * 1024 * 1024, vmem_cap // 8)

    s_ceil = pl.cdiv(S, 128) * 128
    row_bytes = max(1, tile_n * C * itemsize)
    cap_lanes = max(512, (max_block_bytes // row_bytes) // 128 * 128)
    if tile_s is None:
        tile_s = cap_lanes                       # default: biggest block within budget
    tile_s = max(128, (int(tile_s) // 128) * 128)
    tile_s = min(tile_s, s_ceil)

    n_s_total = pl.cdiv(S, tile_s)

    # v7x: if N yields a single block, split the S range across a leading "parallel"
    # axis so both TensorCores stream (pure loop reordering on single-TC v5e/v6e).
    n_splits = 2 if (n_blk_n < 2 and n_s_total >= 2) else 1
    n_s_per_split = pl.cdiv(n_s_total, n_splits)

    x3 = x.reshape(N, C, S)                      # free metadata reshape; NO padding copy
    grid = (n_splits, n_blk_n, n_s_per_split)

    # ---- stage 1: streaming sum / max pooling ----------------------------------
    def pool_kernel(x_ref, sum_ref, max_ref):
        sp = pl.program_id(0)
        si = pl.program_id(2)

        @pl.when(si == 0)
        def _init():
            sum_ref[...] = jnp.zeros(sum_ref.shape, jnp.float32)
            max_ref[...] = jnp.full(max_ref.shape, -jnp.inf, jnp.float32)

        block_start = (sp * n_s_per_split + si) * tile_s
        is_full = block_start + tile_s <= S

        def accumulate(x_for_sum, x_for_max):
            sum_ref[...] += jnp.sum(x_for_sum, axis=-1, dtype=jnp.float32)
            max_ref[...] = jnp.maximum(
                max_ref[...], jnp.max(x_for_max, axis=-1).astype(jnp.float32))

        @pl.when(is_full)
        def _full_block():                       # steady state: zero masking cost
            xt = x_ref[...]
            accumulate(xt, xt)

        @pl.when(jnp.logical_not(is_full))
        def _edge_block():                       # ragged tail (and split overshoot)
            xt = x_ref[...]
            lane = jax.lax.broadcasted_iota(jnp.int32, (1, 1, tile_s), 2)
            valid = (block_start + lane) < S     # broadcast over sublanes
            accumulate(jnp.where(valid, xt, jnp.zeros((), xt.dtype)),
                       jnp.where(valid, xt, jnp.full((), -jnp.inf, xt.dtype)))

    def x_index_map(sp, ni, si):
        # Clamp so the possible overshoot block of the last split stays in-bounds;
        # the kernel fully masks its contribution.
        return (ni, 0, jnp.minimum(sp * n_s_per_split + si, n_s_total - 1))

    block_bytes = tile_n * C * tile_s * itemsize
    vmem_limit = int(min(vmem_cap * 3 // 4, 2 * block_bytes + 16 * 1024 * 1024))

    cost = pl.CostEstimate(
        flops=int(2 * N * C * S),
        transcendentals=0,
        bytes_accessed=int(N * C * S * itemsize + 2 * n_splits * N * C * 4),
    )

    # Note: on v7x, if profiling shows exposed per-step DMA, the x BlockSpec can take
    # pipeline_mode=pl.Buffered(3) (budget a third block in max_block_bytes above).
    sum_part, max_part = pl.pallas_call(
        pool_kernel,
        out_shape=(jax.ShapeDtypeStruct((n_splits, N, C), jnp.float32),
                   jax.ShapeDtypeStruct((n_splits, N, C), jnp.float32)),
        grid_spec=pltpu.PrefetchScalarGridSpec(
            num_scalar_prefetch=0,
            grid=grid,
            in_specs=[pl.BlockSpec((tile_n, C, tile_s), x_index_map)],
            out_specs=[pl.BlockSpec((None, tile_n, C), lambda sp, ni, si: (sp, ni, 0)),
                       pl.BlockSpec((None, tile_n, C), lambda sp, ni, si: (sp, ni, 0))],
        ),
        compiler_params=pltpu.CompilerParams(
            dimension_semantics=("parallel", "parallel", "arbitrary"),
            vmem_limit_bytes=vmem_limit,
        ),
        cost_estimate=cost,
    )(x3)

    # ---- stage 2: combine partials + fused bottleneck + sigmoid (tiny) ----------
    inv_s = float(1.0 / S)

    def finalize_kernel(sum_ref, max_ref, w1t_ref, w2t_ref, o_ref):
        s = sum_ref[0]
        m = max_ref[0]
        for k in range(1, n_splits):             # n_splits is a small Python constant
            s = s + sum_ref[k]
            m = jnp.maximum(m, max_ref[k])
        avg = s * jnp.float32(inv_s)                                   # (N, C)
        p = jnp.concatenate([avg, m], axis=0)                          # (2N, C)
        h = jnp.maximum(
            jnp.dot(p, w1t_ref[...].astype(jnp.float32),
                    preferred_element_type=jnp.float32), 0.0)          # (2N, mid)
        y = jnp.dot(h, w2t_ref[...].astype(jnp.float32),
                    preferred_element_type=jnp.float32)                # (2N, C)
        o_ref[...] = jax.nn.sigmoid(y[:N] + y[N:]).astype(o_ref.dtype)

    att = pl.pallas_call(
        finalize_kernel,
        out_shape=jax.ShapeDtypeStruct((N, C), x.dtype),
    )(sum_part, max_part, w1.T, w2.T)

    return att.reshape(N, C, 1, 1, 1)


def _reference(x, w1, w2):
    """Pure-JAX reference mirroring the PyTorch forward."""
    avg_pool = jnp.mean(x, axis=(2, 3, 4))               # (N, C)
    max_pool = jnp.max(x, axis=(2, 3, 4))                # (N, C)

    def bottleneck(p):
        return jnp.maximum(p @ w1.T, 0.0) @ w2.T

    s = bottleneck(avg_pool) + bottleneck(max_pool)
    return jax.nn.sigmoid(s).reshape(x.shape[0], x.shape[1], 1, 1, 1)


if __name__ == "__main__":
    # Small shapes consistent with the module: n_channels_in=8, reduction_ratio=4.
    N, C = 2, 8
    reduction_ratio = 4
    mid = C // reduction_ratio

    key = jax.random.PRNGKey(0)
    kx1, kx2, k1, k2 = jax.random.split(key, 4)

    # Deterministic "Conv3d 1x1x1, bias=False" weights.
    w1 = jax.random.normal(k1, (mid, C), dtype=jnp.float32) * (1.0 / jnp.sqrt(C))
    w2 = jax.random.normal(k2, (C, mid), dtype=jnp.float32) * (1.0 / jnp.sqrt(mid))

    # Case 1: S = 8*8*8 = 512, explicit tile_s=128 -> 4 full S-blocks split 2x2
    # across the leading "parallel" axis (streaming + dual-core split path).
    x1 = jax.random.normal(kx1, (N, C, 8, 8, 8), dtype=jnp.float32)
    out1 = jax.block_until_ready(channel_attention_3d(x1, w1, w2, tile_s=128))
    ref1 = _reference(x1, w1, w2)
    assert out1.shape == (N, C, 1, 1, 1)
    assert jnp.allclose(out1, ref1, atol=1e-5, rtol=1e-5), "mismatch vs reference (case 1)"

    # Case 2: ragged S = 5*6*11 = 330 with tile_s=128 -> 3 blocks: exercises the
    # in-kernel tail mask (no wrapper padding) AND the fully-masked overshoot block
    # of the second split (odd block count).
    x2 = jax.random.normal(kx2, (N, C, 5, 6, 11), dtype=jnp.float32)
    out2 = jax.block_until_ready(channel_attention_3d(x2, w1, w2, tile_s=128))
    ref2 = _reference(x2, w1, w2)
    assert out2.shape == (N, C, 1, 1, 1)
    assert jnp.allclose(out2, ref2, atol=1e-5, rtol=1e-5), "mismatch vs reference (case 2)"

    # Case 3: default (auto) tile_s -> single VMEM-budget-sized block, no split.
    out3 = jax.block_until_ready(channel_attention_3d(x1, w1, w2))
    assert jnp.allclose(out3, ref1, atol=1e-5, rtol=1e-5), "mismatch vs reference (case 3)"

    print("KERNEL_OK")
</pallas_src>

<mosaic_0001>
module attributes {stable_mosaic.version = 11 : i64} {
  func.func @pool_kernel(%arg0: i32, %arg1: i32, %arg2: i32, %arg3: memref<2x8x128xf32, #tpu.memory_space<vmem>>, %arg4: memref<1x2x8xf32, #tpu.memory_space<vmem>>, %arg5: memref<1x2x8xf32, #tpu.memory_space<vmem>>) attributes {dimension_semantics = [#tpu.dimension_semantics<parallel>, #tpu.dimension_semantics<parallel>, #tpu.dimension_semantics<arbitrary>], iteration_bounds = array<i64: 2, 1, 2>, scalar_prefetch = 0 : i64, scratch_operands = 0 : i64, tpu.core_type = #tpu.core_type<tc>, window_params = [{transform_indices = @transform_0, window_bounds = array<i64: 2, 8, 128>}, {transform_indices = @transform_1, window_bounds = array<i64: 1, 2, 8>}, {transform_indices = @transform_2, window_bounds = array<i64: 1, 2, 8>}]} {
    %c0_i32 = arith.constant 0 : i32
    %0 = arith.cmpi eq, %arg2, %c0_i32 : i32
    %1 = arith.extui %0 : i1 to i32
    %c0_i32_0 = arith.constant 0 : i32
    %2 = arith.cmpi ne, %1, %c0_i32_0 : i32
    scf.if %2 {
      %cst = arith.constant 0.000000e+00 : f32
      %13 = vector.broadcast %cst : f32 to vector<2x8xf32>
      %c0 = arith.constant 0 : index
      %c0_4 = arith.constant 0 : index
      %c0_5 = arith.constant 0 : index
      %14 = vector.load %arg4[%c0, %c0_4, %c0_5] : memref<1x2x8xf32, #tpu.memory_space<vmem>>, vector<1x2x8xf32>
      %15 = vector.shape_cast %14 : vector<1x2x8xf32> to vector<2x8xf32>
      %16 = vector.shape_cast %13 : vector<2x8xf32> to vector<1x2x8xf32>
      tpu.vector_store %arg4[%c0, %c0_4, %c0_5], %16 {strides = array<i32>} : memref<1x2x8xf32, #tpu.memory_space<vmem>>, vector<1x2x8xf32>,
      %cst_6 = arith.constant 0xFF800000 : f32
      %17 = vector.broadcast %cst_6 : f32 to vector<2x8xf32>
      %c0_7 = arith.constant 0 : index
      %c0_8 = arith.constant 0 : index
      %c0_9 = arith.constant 0 : index
      %18 = vector.load %arg5[%c0_7, %c0_8, %c0_9] : memref<1x2x8xf32, #tpu.memory_space<vmem>>, vector<1x2x8xf32>
      %19 = vector.shape_cast %18 : vector<1x2x8xf32> to vector<2x8xf32>
      %20 = vector.shape_cast %17 : vector<2x8xf32> to vector<1x2x8xf32>
      tpu.vector_store %arg5[%c0_7, %c0_8, %c0_9], %20 {strides = array<i32>} : memref<1x2x8xf32, #tpu.memory_space<vmem>>, vector<1x2x8xf32>,
    } else {
    }
    %c2_i32 = arith.constant 2 : i32
    %3 = arith.muli %arg0, %c2_i32 : i32
    %4 = arith.addi %3, %arg2 : i32
    %c128_i32 = arith.constant 128 : i32
    %5 = arith.muli %4, %c128_i32 : i32
    %c128_i32_1 = arith.constant 128 : i32
    %6 = arith.addi %5, %c128_i32_1 : i32
    %c512_i32 = arith.constant 512 : i32
    %7 = arith.cmpi sle, %6, %c512_i32 : i32
    %8 = arith.extui %7 : i1 to i32
    %c0_i32_2 = arith.constant 0 : i32
    %9 = arith.cmpi ne, %8, %c0_i32_2 : i32
    scf.if %9 {
      %c0 = arith.constant 0 : index
      %c0_4 = arith.constant 0 : index
      %c0_5 = arith.constant 0 : index
      %13 = vector.load %arg3[%c0, %c0_4, %c0_5] : memref<2x8x128xf32, #tpu.memory_space<vmem>>, vector<2x8x128xf32>
      %c0_6 = arith.constant 0 : index
      %c0_7 = arith.constant 0 : index
      %c0_8 = arith.constant 0 : index
      %14 = vector.load %arg4[%c0_6, %c0_7, %c0_8] : memref<1x2x8xf32, #tpu.memory_space<vmem>>, vector<1x2x8xf32>
      %15 = vector.shape_cast %14 : vector<1x2x8xf32> to vector<2x8xf32>
      %cst = arith.constant dense<0.000000e+00> : vector<2x8xf32>
      %16 = vector.multi_reduction <add>, %13, %cst [2] : vector<2x8x128xf32> to vector<2x8xf32>
      %17 = arith.addf %15, %16 : vector<2x8xf32>
      %c0_9 = arith.constant 0 : index
      %c0_10 = arith.constant 0 : index
      %c0_11 = arith.constant 0 : index
      %18 = vector.load %arg4[%c0_9, %c0_10, %c0_11] : memref<1x2x8xf32, #tpu.memory_space<vmem>>, vector<1x2x8xf32>
      %19 = vector.shape_cast %18 : vector<1x2x8xf32> to vector<2x8xf32>
      %20 = vector.shape_cast %17 : vector<2x8xf32> to vector<1x2x8xf32>
      tpu.vector_store %arg4[%c0_9, %c0_10, %c0_11], %20 {strides = array<i32>} : memref<1x2x8xf32, #tpu.memory_space<vmem>>, vector<1x2x8xf32>,
      %c0_12 = arith.constant 0 : index
      %c0_13 = arith.constant 0 : index
      %c0_14 = arith.constant 0 : index
      %21 = vector.load %arg5[%c0_12, %c0_13, %c0_14] : memref<1x2x8xf32, #tpu.memory_space<vmem>>, vector<1x2x8xf32>
      %22 = vector.shape_cast %21 : vector<1x2x8xf32> to vector<2x8xf32>
      %cst_15 = arith.constant dense<0xFF800000> : vector<2x8xf32>
      %23 = vector.multi_reduction <maximumf>, %13, %cst_15 [2] : vector<2x8x128xf32> to vector<2x8xf32>
      %24 = arith.maximumf %22, %23 : vector<2x8xf32>
      %c0_16 = arith.constant 0 : index
      %c0_17 = arith.constant 0 : index
      %c0_18 = arith.constant 0 : index
      %25 = vector.load %arg5[%c0_16, %c0_17, %c0_18] : memref<1x2x8xf32, #tpu.memory_space<vmem>>, vector<1x2x8xf32>
      %26 = vector.shape_cast %25 : vector<1x2x8xf32> to vector<2x8xf32>
      %27 = vector.shape_cast %24 : vector<2x8xf32> to vector<1x2x8xf32>
      tpu.vector_store %arg5[%c0_16, %c0_17, %c0_18], %27 {strides = array<i32>} : memref<1x2x8xf32, #tpu.memory_space<vmem>>, vector<1x2x8xf32>,
    } else {
    }
    %true = arith.constant true
    %10 = arith.xori %7, %true : i1
    %11 = arith.extui %10 : i1 to i32
    %c0_i32_3 = arith.constant 0 : i32
    %12 = arith.cmpi ne, %11, %c0_i32_3 : i32
    scf.if %12 {
      %c0 = arith.constant 0 : index
      %c0_4 = arith.constant 0 : index
      %c0_5 = arith.constant 0 : index
      %13 = vector.load %arg3[%c0, %c0_4, %c0_5] : memref<2x8x128xf32, #tpu.memory_space<vmem>>, vector<2x8x128xf32>
      %14 = tpu.iota {dimensions = array<i32: 2>} : vector<1x1x128xi32>
      %15 = vector.broadcast %5 : i32 to vector<1x1x128xi32>
      %16 = arith.addi %15, %14 : vector<1x1x128xi32>
      %c512_i32_6 = arith.constant 512 : i32
      %17 = vector.broadcast %c512_i32_6 : i32 to vector<1x1x128xi32>
      %18 = arith.cmpi slt, %16, %17 : vector<1x1x128xi32>
      %cst = arith.constant 0.000000e+00 : f32
      %19 = vector.shape_cast %18 : vector<1x1x128xi1> to vector<1x1x128xi1>
      %20 = vector.broadcast %19 : vector<1x1x128xi1> to vector<2x8x128xi1>
      %21 = vector.broadcast %cst : f32 to vector<2x8x128xf32>
      %22 = arith.select %20, %13, %21 : vector<2x8x128xi1>, vector<2x8x128xf32>
      %cst_7 = arith.constant 0xFF800000 : f32
      %23 = vector.shape_cast %18 : vector<1x1x128xi1> to vector<1x1x128xi1>
      %24 = vector.broadcast %23 : vector<1x1x128xi1> to vector<2x8x128xi1>
      %25 = vector.broadcast %cst_7 : f32 to vector<2x8x128xf32>
      %26 = arith.select %24, %13, %25 : vector<2x8x128xi1>, vector<2x8x128xf32>
      %c0_8 = arith.constant 0 : index
      %c0_9 = arith.constant 0 : index
      %c0_10 = arith.constant 0 : index
      %27 = vector.load %arg4[%c0_8, %c0_9, %c0_10] : memref<1x2x8xf32, #tpu.memory_space<vmem>>, vector<1x2x8xf32>
      %28 = vector.shape_cast %27 : vector<1x2x8xf32> to vector<2x8xf32>
      %cst_11 = arith.constant dense<0.000000e+00> : vector<2x8xf32>
      %29 = vector.multi_reduction <add>, %22, %cst_11 [2] : vector<2x8x128xf32> to vector<2x8xf32>
      %30 = arith.addf %28, %29 : vector<2x8xf32>
      %c0_12 = arith.constant 0 : index
      %c0_13 = arith.constant 0 : index
      %c0_14 = arith.constant 0 : index
      %31 = vector.load %arg4[%c0_12, %c0_13, %c0_14] : memref<1x2x8xf32, #tpu.memory_space<vmem>>, vector<1x2x8xf32>
      %32 = vector.shape_cast %31 : vector<1x2x8xf32> to vector<2x8xf32>
      %33 = vector.shape_cast %30 : vector<2x8xf32> to vector<1x2x8xf32>
      tpu.vector_store %arg4[%c0_12, %c0_13, %c0_14], %33 {strides = array<i32>} : memref<1x2x8xf32, #tpu.memory_space<vmem>>, vector<1x2x8xf32>,
      %c0_15 = arith.constant 0 : index
      %c0_16 = arith.constant 0 : index
      %c0_17 = arith.constant 0 : index
      %34 = vector.load %arg5[%c0_15, %c0_16, %c0_17] : memref<1x2x8xf32, #tpu.memory_space<vmem>>, vector<1x2x8xf32>
      %35 = vector.shape_cast %34 : vector<1x2x8xf32> to vector<2x8xf32>
      %cst_18 = arith.constant dense<0xFF800000> : vector<2x8xf32>
      %36 = vector.multi_reduction <maximumf>, %26, %cst_18 [2] : vector<2x8x128xf32> to vector<2x8xf32>
      %37 = arith.maximumf %35, %36 : vector<2x8xf32>
      %c0_19 = arith.constant 0 : index
      %c0_20 = arith.constant 0 : index
      %c0_21 = arith.constant 0 : index
      %38 = vector.load %arg5[%c0_19, %c0_20, %c0_21] : memref<1x2x8xf32, #tpu.memory_space<vmem>>, vector<1x2x8xf32>
      %39 = vector.shape_cast %38 : vector<1x2x8xf32> to vector<2x8xf32>
      %40 = vector.shape_cast %37 : vector<2x8xf32> to vector<1x2x8xf32>
      tpu.vector_store %arg5[%c0_19, %c0_20, %c0_21], %40 {strides = array<i32>} : memref<1x2x8xf32, #tpu.memory_space<vmem>>, vector<1x2x8xf32>,
    } else {
    }
    return
  }
  func.func @transform_0(%arg0: i32, %arg1: i32, %arg2: i32) -> (i32, i32, i32) {
    %c2_i32 = arith.constant 2 : i32
    %0 = arith.muli %arg0, %c2_i32 : i32
    %1 = arith.addi %0, %arg2 : i32
    %c3_i32 = arith.constant 3 : i32
    %2 = arith.minsi %1, %c3_i32 : i32
    %c0_i32 = arith.constant 0 : i32
    %c0_i32_0 = arith.constant 0 : i32
    return %arg1, %c0_i32, %2 : i32, i32, i32
  }
  func.func @transform_1(%arg0: i32, %arg1: i32, %arg2: i32) -> (i32, i32, i32) {
    %c0_i32 = arith.constant 0 : i32
    %c0_i32_0 = arith.constant 0 : i32
    return %arg0, %arg1, %c0_i32 : i32, i32, i32
  }
  func.func @transform_2(%arg0: i32, %arg1: i32, %arg2: i32) -> (i32, i32, i32) {
    %c0_i32 = arith.constant 0 : i32
    %c0_i32_0 = arith.constant 0 : i32
    return %arg0, %arg1, %c0_i32 : i32, i32, i32
  }
}

</mosaic_0001>

<bundles_post_ra>
// kernel: tpu_custom_call.1
= control target key start
LH: loop header
LB: loop body
LE: loop exit
PB: predicated region body
PF: predicated region fallthrough
CT: control target
= control target key end

     0   :  { %8 = vsyncpa [#allocation3], 0  ;;  %s1073_s0 = inlined_call_operand.hbm [shape: f32[2,8,512], index: 0, kind: input, shape index: {}]   ;;  %s1074_s1 = inlined_call_operand.hbm [shape: f32[2,2,8], index: 1, kind: output, shape index: {0}]   ;;  %s1075_s2 = inlined_call_operand.hbm [shape: f32[2,2,8], index: 2, kind: output, shape index: {1}]  }
   0x1   :  { %10 = vsyncpa [#allocation3 + $0x1], 0 }
   0x2   :  { %11 = vsyncpa [#allocation4], 0 }
   0x3   :  { %13 = vsyncpa [#allocation4 + $0x1], 0 }
   0x4   :  { %14 = vsyncpa [#allocation7], 0 }
   0x5   :  { %16 = vsyncpa [#allocation7 + $0x1], 0  ;;  %s826_s9 = smov 0   ;;  %s828_s10 = smov 0  }
   0x6   :  { %s830_s11 = smov 0   ;;  %s832_s12 = smov 0  }
   0x7   :  { %s834_s13 = smov 0   ;;  %s836_s14 = smov 0  }
   0x8   :  { %s838_s15 = smov 0   ;;  %s840_s16 = smov 0  }
   0x9   :  { %s842_s17 = smov 0   ;;  %s844_s18 = smov 0  }
   0xa   :  { %s846_s19 = smov 0  }
   0xb LB: > { %s487_s20 = sadd.s32 4294967295, %s801_s19   ;;  %s488_s21 = sadd.s32 4294967294, %s801_s19   ;;  %s801_s19 = sphi %s846_s19, %s22_s19   ;;  %s797_s18 = sphi %s844_s18, %s1098_s18   ;;  %s793_s17 = sphi %s842_s17, %s1097_s17   ;;  %s789_s16 = sphi %s840_s16, %s1096_s16   ;;  %s785_s15 = sphi %s838_s15, %s1095_s15   ;;  %s781_s14 = sphi %s836_s14, %s1094_s14   ;;  %s777_s13 = sphi %s834_s13, %s1093_s13   ;;  %s773_s12 = sphi %s832_s12, %s1092_s12   ;;  %s769_s11 = sphi %s830_s11, %s1091_s11   ;;  %s765_s10 = sphi %s828_s10, %s1090_s10   ;;  %s761_s9 = sphi %s826_s9, %s1089_s9  }
   0xc   : > { %s34_s22 = sadd.s32 1, %s793_s17  ;;  %s41_s23 = sadd.s32 1, %s797_s18 }
   0xd   : > { %p35_p0 = scmp.ge.s32.totalorder %s34_s22, 2  ;;  %s489_s24 = sshll.u32 %s797_s18, 1 }
   0xe   : > { %s46_s25 = sadd.s32 %s793_s17, %s489_s24  ;;  %s58_s26 = sadd.s32 1, %s781_s14 }
   0xf   : > { %s1100_s22 = smov (%p35_p0, %s34_s22), 0  ;;  %s1102_s23 = smov (!%p35_p0, %s41_s23), %s797_s18 }
  0x10   : > { %1079 = sst [smem:[#allocation11_spill]] %s1100_s22  ;;  %p47_p1 = scmp.lt.s32.totalorder %s46_s25, 3 }
  0x11   : > { %p65_p2 = scmp.ne.s32.totalorder %s781_s14, %s777_s13  ;;  %p43_p3 = scmp.ge.s32.totalorder %s1102_s23, 2 }
  0x12   : > { %p66_p4 = scmp.eq.s32.totalorder %s801_s19, 0  ;;  %s1104_s25 = smov (!%p47_p1, %s46_s25), 3 }
  0x13   : > { %s1106_s23 = smov (%p43_p3, %s1102_s23), 0  ;;  %p71_p6 = scmp.ne.s32.totalorder %s777_s13, %s773_s12 }
  0x14   : > { %1080 = sst [smem:[#allocation12_spill]] %s1106_s23  ;;  %p896_p5 = por %p66_p4, %p65_p2 }
  0x15   : > { %s490_s28 = sshll.u32 %s1106_s23, 1  ;;  %p72_p7 = scmp.eq.s32.totalorder %s487_s20, 0 }
  0x16   : > { %s50_s29 = sadd.s32 %s490_s28, %s1100_s22  ;;  %s81_s30 = ssub.s32 %s797_s18, %s1106_s23 }
  0x17   : > { %p51_p8 = scmp.lt.s32.totalorder %s50_s29, 3  ;;  %p908_p9 = por %p72_p7, %p71_p6 }
  0x18   : > { %p84_p10 = scmp.eq.s32.totalorder %s81_s30, 0  ;;  %s86_s4 = sadd.s32 1, %s769_s11 }
  0x19   : > { %s1108_s29 = smov (!%p51_p8, %s50_s29), 3  ;;  %p96_p11 = scmp.ne.s32.totalorder %s769_s11, %s765_s10 }
  0x1a   : > { %s914_s5 = scalar_select %p84_p10, %s769_s11, %s86_s4  }
  0x1b   : > { %s54_s6 = ssub.s32 %s1104_s25, %s1108_s29  ;;  %p97_p13 = scmp.eq.s32.totalorder %s487_s20, 3 }
  0x1c   : > { %p56_p12 = scmp.eq.s32.totalorder %s54_s6, 0  ;;  %p102_p0 = scmp.ne.s32.totalorder %s765_s10, %s761_s9 }
  0x1d   : > { %p103_p1 = scmp.eq.s32.totalorder %s488_s21, 3  ;;  %p927_p2 = por %p97_p13, %p96_p11 }
  0x1e   : > { %s925_s7 = scalar_select %p56_p12, %s781_s14, %s58_s26  }
  0x1f   : > { %p931_p3 = por %p103_p1, %p102_p0  ;;  %p528_p4 = scmp.lt.s32.totalorder %s801_s19, 4 }
  0x20   : > { %s151_s24 = sand.u32 1, %s781_s14   ;;  %s495_s28 = sshll.u32 %s1104_s25, 7 }
  0x21   : > { %s493_s29 = sshll.u32 %s151_s24, 4  ;;  %s167_s20 = scalar_lea.hbm %s1073_s0, %s495_s28 }
  0x22   : > { %s155_s6 = scalar_lea.vmem [#allocation2], %s493_s29  ;;  %p942_p6 = pnand %p528_p4, %p896_p5 }
  0x23   : > { %s168_s21 = sshll.u32 %s155_s6, 4  ;;  %p496_p7 = scmp.ge.s32.totalorder %s801_s19, 1  ;;  %s169_s21 = int_to_ptr.vmem [resolvable:$true] %s168_s21 }
  0x24   : > { %s152_s23 = scalar_lea.sflag [#allocation3], %s151_s24  ;;  %p625_p8 = pneg %p942_p6 }
  0x25   : > { %s636_s22 = scalar_lea.vmem %s169_s21, 256  ;;  %s803_s25 = smov [#allocation2]  }
  0x26   : > { %p637_p10 = scmp.ne.s32.totalorder %s169_s21, %s636_s22  ;;  %s641_s30 = sshll.u32 %s803_s25, 4  ;;  %s642_s30 = int_to_ptr.vmem [resolvable:$false] %s641_s30 }
  0x27   : > { %s643_s28 = scalar_lea.vmem %s642_s30, 512  ;;  %p644_p13 = scmp.lt.s32.totalorder %s169_s21, %s642_s30 }
  0x28   : > { %p639_p11 = pnand %p637_p10, %p625_p8  ;;  %p645_p0 = scmp.lt.s32.totalorder %s643_s28, %s636_s22 }
  0x2a   : > { %p640_p12 = pneg %p639_p11  ;;  %p646_p5 = por %p645_p0, %p644_p13 }
  0x2c   : > { %p647_p1 = pnand %p646_p5, %p640_p12 }
  0x2e   : > { %650 = shalt.err (!%p647_p1)
}
  0x2f   : > { %s804_s27 = smov 512   ;;  %s805_s24 = smov 128  }
  0x30   : > { %s806_s29 = smov 8   ;;  %p176_p4 = scmp.lt.s32.totalorder %s801_s19, 5 }
  0x31   : > { %520 = dma.hbm_to_vmem [thread:$0]  (!%p942_p6), %s167_s20, 256, %s169_s21, %s152_s23, %s804_s27, %s805_s24, %s806_s29  }
  0x32   : > { %p177_p8 = pnand %p496_p7, %p176_p4 }
  0x33   : > { %s182_s4 = sand.u32 (!%p177_p8), 1, %s777_s13  }
  0x34   : > { %180 = sbr.rel (%p177_p8) target bundleno = 437 (0x1b5), region = 24  ;;  %s497_s6 = sshll.u32 (!%p177_p8), %s182_s4, 4 }
  0x35   : > { %s183_s22 = scalar_lea.sflag (!%p177_p8), [#allocation3], %s182_s4  ;;  %s955_s25 = scalar_lea.vmem (!%p177_p8), [#allocation2], %s497_s6 }
  0x39   : > { %748 = dma.done.wait (%p908_p9), %s183_s22, 256  }
  0x3a   : > { %750 = vsyncadd (%p908_p9), %s183_s22, 4294967040  ;;  %s962_s30 = sand.u32 1, %s765_s10   ;;  %p500_p6 = scmp.ne.s32.totalorder %s785_s15, 0 }
  0x3b   : > { %s498_s23 = sshll.u32 %s962_s30, 1 }
  0x3c   : > { %s965_s20 = scalar_lea.vmem [#allocation5], %s498_s23  ;;  %s967_s21 = scalar_lea.vmem [#allocation6], %s498_s23 }
  0x3d   : > { %220 = sbr.rel (%p500_p6) target bundleno = 68 (0x44), region = 32 }
  0x42   : > { %vm221_vm0 = vcmask 58368   ;;  %v807_v0 = vmov 0.0   ;;  %v808_v1 = vmov -inf  }
  0x43   : > { %222 = vst.msk [vmem:[%s965_s20] sm:$0x3] %vm221_vm0, %v807_v0  ;;  %223 = vst.msk [vmem:[%s967_s21] sm:$0x3] %vm221_vm0, %v808_v1 }
  0x44 PF: > { %s501_s3 = sshll.u32 %s789_s16, 1 }
  0x45   : > { %s974_s26 = sadd.s32 %s785_s15, %s501_s3 }
  0x46   : > { %s502_s28 = sshll.u32 %s974_s26, 7 }
  0x47   : > { %s979_s27 = sadd.s32 128, %s502_s28 }
  0x48   : > { %p503_p9 = scmp.gt.s32.totalorder %s979_s27, 512 }
  0x4a   : > { %231 = sbr.rel (%p503_p9) target bundleno = 228 (0xe4), region = 36 }
  0x4f   : > { %v232_v2 = vld [vmem:[%s955_s25] sm:$0xff]  ;;  %v233_v3 = vld [vmem:[%s955_s25 + $0x8] sm:$0xff]  ;;  %v241_v4 = vlaneseq  ;;  %vm251_vm1 = vcmask 1041409   ;;  %vm255_vm2 = vcmask 58368  }
  0x50   : > { %258 = vmax.xlane.f32.xlu1 %v232_v2  ;;  %235 = vadd.xlane.f32.xlu0 %v232_v2  ;;  %v257_v14 = vld [vmem:[%s967_s21] sm:$0x3]  ;;  %v234_v16 = vld [vmem:[%s965_s20] sm:$0x3] }
  0x51   : > { %v242_v5 = vand.u32 127, %v241_v4  ;;  %v244_v6 = vshrl.u32 %v241_v4, 7 }
  0x53   : > { %v245_v9 = vsub.s32 %v242_v5, %v244_v6 }
  0x54   : > { %260 = vmax.xlane.f32.xlu1 %v233_v3  ;;  %237 = vadd.xlane.f32.xlu0 %v233_v3 }
  0xd9   : > { %v259_v7 = vpop.xlane.xlu1 %258  ;;  %v236_v8 = vpop.xlane.xlu0 %235 }
  0xda   : > { %v267_v12 = vrot.slane %v259_v7, %v245_v9  ;;  %v246_v13 = vrot.slane %v236_v8, %v245_v9 }
  0xdd   : > { %v261_v10 = vpop.xlane.xlu1 %260  ;;  %v238_v11 = vpop.xlane.xlu0 %237 }
  0xde   : > { %v271_v15 = vrot.slane %v261_v10, %v245_v9  ;;  %v250_v17 = vrot.slane %v238_v11, %v245_v9 }
  0xe0   : > { %v272_v18 = vsel %vm251_vm1, %v271_v15, %v267_v12  ;;  %v252_v19 = vsel %vm251_vm1, %v250_v17, %v246_v13 }
  0xe1   : > { %v274_v20 = vmax.f32 %v257_v14, %v272_v18  ;;  %v254_v21 = vadd.f32 %v252_v19, %v234_v16 }
  0xe3   : > { %275 = vst.msk [vmem:[%s967_s21] sm:$0x3] %vm255_vm2, %v274_v20  ;;  %256 = vst.msk [vmem:[%s965_s20] sm:$0x3] %vm255_vm2, %v254_v21 }
  0xe4 PF: > { %p504_p7 = scmp.le.s32.totalorder %s979_s27, 512 }
  0xe6   : > { %279 = sbr.rel (%p504_p7) target bundleno = 391 (0x187), region = 40 }
  0xeb   : > { %v282_v22 = vlaneseq  ;;  %v284_v23 = vstv %s502_s28  ;;  %v280_v26 = vld [vmem:[%s955_s25] sm:$0xff]  ;;  %v281_v29 = vld [vmem:[%s955_s25 + $0x8] sm:$0xff]  ;;  %vm308_vm4 = vcmask 1041409   ;;  %vm312_vm5 = vcmask 58368  }
  0xec   : > { %v314_v40 = vld [vmem:[%s967_s21] sm:$0x3]  ;;  %v293_v42 = vld [vmem:[%s965_s20] sm:$0x3] }
  0xed   : > { %v283_v24 = vand.u32 127, %v282_v22  ;;  %v301_v25 = vshrl.u32 %v282_v22, 7 }
  0xef   : > { %v285_v27 = vadd.s32 %v284_v23, %v283_v24  ;;  %v302_v28 = vsub.s32 %v283_v24, %v301_v25 }
  0xf1   : > { %vm286_vm3 = vcmp.lt.s32.totalorder %v285_v27, 512 }
  0xf2   : > { %v291_v30 = vsel %vm286_vm3, %v280_v26, -inf  ;;  %v289_v31 = vsel %vm286_vm3, %v280_v26, 0.0  ;;  %v292_v32 = vsel %vm286_vm3, %v281_v29, -inf  ;;  %v290_v33 = vsel %vm286_vm3, %v281_v29, 0.0 }
  0xf3   : > { %315 = vmax.xlane.f32.xlu1 %v291_v30  ;;  %294 = vadd.xlane.f32.xlu0 %v289_v31 }
  0xf7   : > { %317 = vmax.xlane.f32.xlu1 %v292_v32  ;;  %296 = vadd.xlane.f32.xlu0 %v290_v33 }
 0x17c   : > { %v316_v34 = vpop.xlane.xlu1 %315  ;;  %v295_v35 = vpop.xlane.xlu0 %294 }
 0x17d   : > { %v324_v38 = vrot.slane %v316_v34, %v302_v28  ;;  %v303_v39 = vrot.slane %v295_v35, %v302_v28 }
 0x180   : > { %v318_v36 = vpop.xlane.xlu1 %317  ;;  %v297_v37 = vpop.xlane.xlu0 %296 }
 0x181   : > { %v328_v41 = vrot.slane %v318_v36, %v302_v28  ;;  %v307_v43 = vrot.slane %v297_v37, %v302_v28 }
 0x183   : > { %v329_v44 = vsel %vm308_vm4, %v328_v41, %v324_v38  ;;  %v309_v45 = vsel %vm308_vm4, %v307_v43, %v303_v39 }
 0x184   : > { %v331_v46 = vmax.f32 %v314_v40, %v329_v44  ;;  %v311_v47 = vadd.f32 %v309_v45, %v293_v42 }
 0x186   : > { %332 = vst.msk [vmem:[%s967_s21] sm:$0x3] %vm312_vm5, %v331_v46  ;;  %313 = vst.msk [vmem:[%s965_s20] sm:$0x3] %vm312_vm5, %v311_v47 }
 0x187 PF: > { %s1078_s15 = sshll.u32 %s789_s16, 5  ;;  %s353_s6 = sshll.u32 %s965_s20, 4  ;;  %s354_s6 = int_to_ptr.vmem [resolvable:$true] %s353_s6 }
 0x188   : > { %s351_s4 = scalar_lea.hbm %s1074_s1, %s1078_s15  ;;  %s334_s22 = scalar_lea.sflag [#allocation4], %s962_s30 }
 0x189   : > { %s651_s25 = scalar_lea.vmem %s354_s6, 32  ;;  %s809_s23 = smov [#allocation5]  }
 0x18a   : > { %p652_p10 = scmp.ne.s32.totalorder %s354_s6, %s651_s25  ;;  %s655_s3 = sshll.u32 %s809_s23, 4  ;;  %s656_s3 = int_to_ptr.vmem [resolvable:$false] %s655_s3 }
 0x18b   : > { %s657_s26 = scalar_lea.vmem %s656_s3, 64  ;;  %p658_p13 = scmp.lt.s32.totalorder %s354_s6, %s656_s3 }
 0x18c   : > { %p653_p11 = pnand %p652_p10, %p927_p2  ;;  %p659_p0 = scmp.lt.s32.totalorder %s657_s26, %s651_s25 }
 0x18e   : > { %p654_p12 = pneg %p653_p11  ;;  %p660_p5 = por %p659_p0, %p658_p13 }
 0x190   : > { %p661_p1 = pnand %p660_p5, %p654_p12 }
 0x192   : > { %664 = shalt.err (!%p661_p1)
}
 0x193   : > { %s665_s28 = scalar_lea.hbm %s351_s4, 32  ;;  %s669_s24 = scalar_lea.hbm %s1074_s1, 64 }
 0x194   : > { %p666_p4 = scmp.ne.s32.totalorder %s351_s4, %s665_s28  ;;  %p670_p9 = scmp.lt.s32.totalorder %s351_s4, %s1074_s1 }
 0x195   : > { %p671_p7 = scmp.lt.s32.totalorder %s669_s24, %s665_s28 }
 0x196   : > { %p667_p8 = pnand %p666_p4, %p927_p2 }
 0x197   : > { %p672_p10 = por %p671_p7, %p670_p9 }
 0x198   : > { %p668_p6 = pneg %p667_p8 }
 0x19a   : > { %p673_p11 = pnand %p672_p10, %p668_p6 }
 0x19c   : > { %676 = shalt.err (!%p673_p11)
}
 0x19d   : > { %513 = dma.vmem_to_hbm [thread:$0]  (%p927_p2), %s354_s6, 32, %s351_s4, %s334_s22  }
 0x19e   : > { %s1086_s25 = sshll.u32 %s789_s16, 5  ;;  %s367_s20 = sshll.u32 %s967_s21, 4  ;;  %s368_s20 = int_to_ptr.vmem [resolvable:$true] %s367_s20 }
 0x19f   : > { %s365_s26 = scalar_lea.hbm %s1075_s2, %s1086_s25  ;;  %s339_s15 = scalar_lea.sflag [#allocation7], %s962_s30 }
 0x1a0   : > { %s677_s27 = scalar_lea.vmem %s368_s20, 32  ;;  %s810_s28 = smov [#allocation6]  }
 0x1a1   : > { %p678_p12 = scmp.ne.s32.totalorder %s368_s20, %s677_s27  ;;  %s681_s24 = sshll.u32 %s810_s28, 4  ;;  %s682_s24 = int_to_ptr.vmem [resolvable:$false] %s681_s24 }
 0x1a2   : > { %s683_s29 = scalar_lea.vmem %s682_s24, 64  ;;  %p684_p5 = scmp.lt.s32.totalorder %s368_s20, %s682_s24 }
 0x1a3   : > { %p679_p13 = pnand %p678_p12, %p927_p2  ;;  %p685_p1 = scmp.lt.s32.totalorder %s683_s29, %s677_s27 }
 0x1a5   : > { %p680_p0 = pneg %p679_p13  ;;  %p686_p4 = por %p685_p1, %p684_p5 }
 0x1a7   : > { %p687_p8 = pnand %p686_p4, %p680_p0 }
 0x1a9   : > { %690 = shalt.err (!%p687_p8)
}
 0x1aa   : > { %s691_s16 = scalar_lea.hbm %s365_s26, 32  ;;  %s695_s4 = scalar_lea.hbm %s1075_s2, 64 }
 0x1ab   : > { %p692_p6 = scmp.ne.s32.totalorder %s365_s26, %s691_s16  ;;  %p696_p10 = scmp.lt.s32.totalorder %s365_s26, %s1075_s2 }
 0x1ac   : > { %p697_p11 = scmp.lt.s32.totalorder %s695_s4, %s691_s16 }
 0x1ad   : > { %p693_p9 = pnand %p692_p6, %p927_p2 }
 0x1ae   : > { %p698_p12 = por %p697_p11, %p696_p10 }
 0x1af   : > { %p694_p7 = pneg %p693_p9 }
 0x1b1   : > { %p699_p13 = pnand %p698_p12, %p694_p7 }
 0x1b3   : > { %702 = shalt.err (!%p699_p13)
}
 0x1b4   : > { %514 = dma.vmem_to_hbm [thread:$0]  (%p927_p2), %s368_s20, 32, %s365_s26, %s339_s15  }
 0x1b5 PF: > { %p529_p0 = scmp.ge.s32.totalorder %s801_s19, 2  ;;  %s379_s25 = sand.u32 1, %s761_s9  }
 0x1b6   : > { %s380_s23 = scalar_lea.sflag [#allocation4], %s379_s25 }
 0x1b7   : > { %p522_p5 = pnand %p529_p0, %p931_p3 }
 0x1b9   : > { %p523_p1 = pneg %p522_p5 }
 0x1bb   : > { %752 = dma.done.wait (%p523_p1), %s380_s23, 32  }
 0x1bc   : > { %754 = vsyncadd (%p523_p1), %s380_s23, 4294967264  ;;  %s389_s3 = scalar_lea.sflag [#allocation7], %s379_s25 }
 0x1bd   : > { %756 = dma.done.wait (%p523_p1), %s389_s3, 32  }
 0x1be   : > { %758 = vsyncadd (%p523_p1), %s389_s3, 4294967264  ;;  %s22_s19 = sadd.s32 1, %s801_s19   ;;  %s1087_s8 = sld [smem:[#allocation11_spill]] }
 0x1bf   : > { %p19_p4 = scmp.ge.s32.totalorder %s22_s19, 6   ;;  %s1088_s26 = sld [smem:[#allocation12_spill]] }
 0x1c0   : > { %s1089_s9 = smov %s765_s10  ;;  %s1090_s10 = smov %s769_s11 }
 0x1c1   : > { %s1091_s11 = smov %s914_s5  ;;  %s1092_s12 = smov %s777_s13 }
 0x1c2   : > { %s1093_s13 = smov %s781_s14  ;;  %s1094_s14 = smov %s925_s7 }
 0x1c3   : > { %s1095_s15 = smov %s793_s17  ;;  %s1096_s16 = smov %s797_s18 }
 0x1c4   : > { %s1097_s17 = smov %s1087_s8  ;;  %21 = sbr.rel (!%p19_p4) target bundleno = 11 (0xb), region = 98 }
 0x1c5   : > { %s1098_s18 = smov %s1088_s26 }
 0x1c9   :  { %394 = vsyncpa [#allocation3], 1 }
 0x1ca   :  { %396 = vsyncpa [#allocation3 + $0x1], 1 }
 0x1cb   :  { %397 = vsyncpa [#allocation4], 1 }
 0x1cc   :  { %399 = vsyncpa [#allocation4 + $0x1], 1 }
 0x1cd   :  { %400 = vsyncpa [#allocation7], 1 }
 0x1ce   :  { %402 = vsyncpa [#allocation7 + $0x1], 1 }

</bundles_post_ra>
